<compile_context>
chip_gen: v5e
topology: v5e:2x2
jax: 0.10.0
libtpu: 0.0.40
codegen_flags: <defaults>
</compile_context>

<pallas_src>
import functools

import jax
import jax.numpy as jnp
from jax.experimental import pallas as pl
from jax.experimental.pallas import tpu as pltpu


def _round_up(x, m):
    return (x + m - 1) // m * m


def focal_loss_kernel(logits_ref, target_ref, partial_ref, *,
                      gamma, n_total, tile_rows, need_mask):
    # logits_ref:  (TN, C) native dtype in VMEM (class dim on the lane axis)
    # target_ref:  (TN, 1) int32 in VMEM
    # partial_ref: (1, 1)  f32 in SMEM — this tile's partial sum of focal terms
    i = pl.program_id(0)

    logits = logits_ref[...].astype(jnp.float32)          # cast after the load
    tgt = target_ref[...]                                  # (TN, 1) int32
    tn, c = logits.shape

    # Numerically stable softmax pieces (shared between lse and pt).
    m = jnp.max(logits, axis=-1, keepdims=True)             # (TN, 1)
    shifted = logits - m
    exps = jnp.exp(shifted)                                  # (TN, C), single EUP pass
    sumexp = jnp.sum(exps, axis=-1, keepdims=True)           # (TN, 1)

    # Pick the target-class entries without materializing a float one-hot.
    class_ids = jax.lax.broadcasted_iota(jnp.int32, (tn, c), 1)
    onehot = class_ids == tgt
    picked_shifted = jnp.sum(jnp.where(onehot, shifted, 0.0),
                             axis=-1, keepdims=True)         # logit[tgt] - m
    picked_exp = jnp.sum(jnp.where(onehot, exps, 0.0),
                         axis=-1, keepdims=True)             # exp(logit[tgt] - m)

    ce = jnp.log(sumexp) - picked_shifted                    # cross-entropy, reduction='none'
    pt = picked_exp / sumexp                                 # exp(-ce), no second exp()
    q = 1.0 - pt

    # Integer-power fast path: for gamma == 2 this is one VALU multiply instead
    # of a log+exp pow on the already-busy EUP (and avoids pow(0, g) edge cases).
    g = float(gamma)
    if g == float(int(g)) and int(g) >= 0:
        w = jnp.ones_like(q)
        for _ in range(int(g)):
            w = w * q
    else:
        w = q ** g

    focal = w * ce
    if need_mask:
        # Mask rows past the true batch size (padded last tile). NaN-safe:
        # garbage rows are discarded by the where().
        row_ids = jax.lax.broadcasted_iota(jnp.int32, (tn, 1), 0) + i * tile_rows
        focal = jnp.where(row_ids < n_total, focal, 0.0)

    # alpha and 1/N are applied once on the reduced scalar in the wrapper.
    partial_ref[0, 0] = jnp.sum(focal)


def focal_loss(logits, targets, *, gamma=2.0, alpha=1.0, tile_rows=None):
    """logits: (N, C) float (any dtype); targets: (N,) int. Returns scalar f32 focal loss."""
    n, c = logits.shape
    tgt2d = targets.reshape(n, 1).astype(jnp.int32)

    # Choose a row tile that keeps 2 double-buffered (TN, C) logits blocks
    # comfortably inside a small VMEM budget (safe on v7x's 64 MiB VMEM too).
    # TODO(synk): add a flash-style C-tile axis with online logsumexp for
    # vocab-scale C where a single (TN, C) row block would not fit VMEM.
    bytes_per = jnp.dtype(logits.dtype).itemsize
    if tile_rows is None:
        budget = 8 * 1024 * 1024                       # per-input VMEM budget
        cap = max(8, (budget // (2 * c * bytes_per)) // 8 * 8)
        tile_rows = min(512, _round_up(n, 8), cap)
    tile_rows = max(8, _round_up(int(tile_rows), 8))

    num_tiles = pl.cdiv(n, tile_rows)
    need_mask = (n % tile_rows) != 0

    kernel = functools.partial(
        focal_loss_kernel, gamma=float(gamma), n_total=n,
        tile_rows=tile_rows, need_mask=need_mask)

    partials = pl.pallas_call(
        kernel,
        out_shape=jax.ShapeDtypeStruct((num_tiles, 1), jnp.float32),
        grid=(num_tiles,),
        in_specs=[
            pl.BlockSpec((tile_rows, c), lambda i: (i, 0)),   # logits tile (VMEM)
            pl.BlockSpec((tile_rows, 1), lambda i: (i, 0)),   # targets tile (VMEM)
        ],
        out_specs=pl.BlockSpec((1, 1), lambda i: (i, 0),
                               memory_space=pltpu.MemorySpace.SMEM),
        compiler_params=pltpu.CompilerParams(
            dimension_semantics=("parallel",),        # tiles are independent partial sums
            vmem_limit_bytes=32 * 1024 * 1024,
        ),
    )(logits, tgt2d)

    # Single scalar multiply for alpha and the global-N mean.
    return jnp.sum(partials) * jnp.float32(float(alpha) / n)


def focal_loss_ref(logits, targets, *, gamma=2.0, alpha=1.0):
    """Pure-JAX reference (matches torch cross_entropy + focal weighting)."""
    logits = logits.astype(jnp.float32)
    logp = jax.nn.log_softmax(logits, axis=-1)
    ce = -jnp.take_along_axis(logp, targets[:, None].astype(jnp.int32), axis=-1)[:, 0]
    pt = jnp.exp(-ce)
    return jnp.mean(alpha * (1.0 - pt) ** gamma * ce)


if __name__ == "__main__":
    key = jax.random.PRNGKey(0)
    k1, k2, k3, k4, k5, k6 = jax.random.split(key, 6)

    # Primary small case: single tile.
    N, C = 8, 32
    logits = jax.random.normal(k1, (N, C), dtype=jnp.float32)
    targets = jax.random.randint(k2, (N,), 0, C, dtype=jnp.int32)
    out = jax.block_until_ready(focal_loss(logits, targets, gamma=2.0, alpha=1.0))
    ref = focal_loss_ref(logits, targets, gamma=2.0, alpha=1.0)
    assert jnp.allclose(out, ref, rtol=1e-5, atol=1e-6), (out, ref)

    # Multi-tile case with a masked partial last tile (N not a multiple of TN).
    N2, C2 = 40, 32
    logits2 = jax.random.normal(k3, (N2, C2), dtype=jnp.float32)
    targets2 = jax.random.randint(k4, (N2,), 0, C2, dtype=jnp.int32)
    out2 = jax.block_until_ready(
        focal_loss(logits2, targets2, gamma=2.0, alpha=1.0, tile_rows=16))
    ref2 = focal_loss_ref(logits2, targets2, gamma=2.0, alpha=1.0)
    assert jnp.allclose(out2, ref2, rtol=1e-5, atol=1e-6), (out2, ref2)

    # bf16 logits path (native-dtype load, f32 compute) with non-default alpha.
    N3, C3 = 24, 16
    logits3 = jax.random.normal(k5, (N3, C3), dtype=jnp.bfloat16)
    targets3 = jax.random.randint(k6, (N3,), 0, C3, dtype=jnp.int32)
    out3 = jax.block_until_ready(
        focal_loss(logits3, targets3, gamma=2.0, alpha=0.5, tile_rows=8))
    ref3 = focal_loss_ref(logits3, targets3, gamma=2.0, alpha=0.5)
    assert jnp.allclose(out3, ref3, rtol=1e-4, atol=1e-6), (out3, ref3)

    print("KERNEL_OK")
</pallas_src>

<mosaic_0001>
module attributes {stable_mosaic.version = 11 : i64} {
  func.func @focal_loss_kernel(%arg0: i32, %arg1: memref<8x32xf32, #tpu.memory_space<vmem>>, %arg2: memref<8x1xi32, #tpu.memory_space<vmem>>, %arg3: memref<1x1xf32, #tpu.memory_space<smem>>) attributes {dimension_semantics = [#tpu.dimension_semantics<parallel>], iteration_bounds = array<i64: 1>, scalar_prefetch = 0 : i64, scratch_operands = 0 : i64, tpu.core_type = #tpu.core_type<tc>, window_params = [{transform_indices = @transform_0, window_bounds = array<i64: 8, 32>}, {transform_indices = @transform_1, window_bounds = array<i64: 8, 1>}, {transform_indices = @transform_2, window_bounds = array<i64: 1, 1>}]} {
    %c0 = arith.constant 0 : index
    %c0_0 = arith.constant 0 : index
    %0 = vector.load %arg1[%c0, %c0_0] : memref<8x32xf32, #tpu.memory_space<vmem>>, vector<8x32xf32>
    %c0_1 = arith.constant 0 : index
    %c0_2 = arith.constant 0 : index
    %1 = vector.load %arg2[%c0_1, %c0_2] : memref<8x1xi32, #tpu.memory_space<vmem>>, vector<8x1xi32>
    %cst = arith.constant dense<0xFF800000> : vector<8xf32>
    %2 = vector.multi_reduction <maximumf>, %0, %cst [1] : vector<8x32xf32> to vector<8xf32>
    %3 = vector.shape_cast %2 : vector<8xf32> to vector<8x1xf32>
    %4 = vector.broadcast %3 : vector<8x1xf32> to vector<8x32xf32>
    %5 = arith.subf %0, %4 : vector<8x32xf32>
    %6 = math.exp %5 : vector<8x32xf32>
    %cst_3 = arith.constant dense<0.000000e+00> : vector<8xf32>
    %7 = vector.multi_reduction <add>, %6, %cst_3 [1] : vector<8x32xf32> to vector<8xf32>
    %8 = vector.shape_cast %7 : vector<8xf32> to vector<8x1xf32>
    %9 = tpu.iota {dimensions = array<i32: 1>} : vector<8x32xi32>
    %10 = vector.broadcast %1 : vector<8x1xi32> to vector<8x32xi32>
    %11 = arith.cmpi eq, %9, %10 : vector<8x32xi32>
    %cst_4 = arith.constant 0.000000e+00 : f32
    %12 = vector.broadcast %cst_4 : f32 to vector<8x32xf32>
    %13 = arith.select %11, %5, %12 : vector<8x32xi1>, vector<8x32xf32>
    %cst_5 = arith.constant dense<0.000000e+00> : vector<8xf32>
    %14 = vector.multi_reduction <add>, %13, %cst_5 [1] : vector<8x32xf32> to vector<8xf32>
    %15 = vector.shape_cast %14 : vector<8xf32> to vector<8x1xf32>
    %cst_6 = arith.constant 0.000000e+00 : f32
    %16 = vector.broadcast %cst_6 : f32 to vector<8x32xf32>
    %17 = arith.select %11, %6, %16 : vector<8x32xi1>, vector<8x32xf32>
    %cst_7 = arith.constant dense<0.000000e+00> : vector<8xf32>
    %18 = vector.multi_reduction <add>, %17, %cst_7 [1] : vector<8x32xf32> to vector<8xf32>
    %19 = vector.shape_cast %18 : vector<8xf32> to vector<8x1xf32>
    %20 = math.log %8 : vector<8x1xf32>
    %21 = arith.subf %20, %15 : vector<8x1xf32>
    %22 = arith.divf %19, %8 : vector<8x1xf32>
    %cst_8 = arith.constant 1.000000e+00 : f32
    %23 = vector.broadcast %cst_8 : f32 to vector<8x1xf32>
    %24 = arith.subf %23, %22 : vector<8x1xf32>
    %cst_9 = arith.constant 1.000000e+00 : f32
    %25 = vector.broadcast %cst_9 : f32 to vector<8x1xf32>
    %26 = arith.mulf %25, %24 : vector<8x1xf32>
    %27 = arith.mulf %26, %24 : vector<8x1xf32>
    %28 = arith.mulf %27, %21 : vector<8x1xf32>
    %29 = vector.shape_cast %28 : vector<8x1xf32> to vector<1x8x1xf32>
    %cst_10 = arith.constant dense<0.000000e+00> : vector<1xf32>
    %30 = vector.multi_reduction <add>, %29, %cst_10 [1, 2] : vector<1x8x1xf32> to vector<1xf32>
    %31 = vector.shape_cast %30 : vector<1xf32> to vector<1x1x1xf32>
    %32 = vector.extract %31[0, 0, 0] : f32 from vector<1x1x1xf32>
    %c0_11 = arith.constant 0 : index
    %c0_12 = arith.constant 0 : index
    %33 = memref.load %arg3[%c0_11, %c0_12] : memref<1x1xf32, #tpu.memory_space<smem>>
    memref.store %32, %arg3[%c0_11, %c0_12] : memref<1x1xf32, #tpu.memory_space<smem>>
    return
  }
  func.func @transform_0(%arg0: i32) -> (i32, i32) {
    %c0_i32 = arith.constant 0 : i32
    %c0_i32_0 = arith.constant 0 : i32
    return %arg0, %c0_i32 : i32, i32
  }
  func.func @transform_1(%arg0: i32) -> (i32, i32) {
    %c0_i32 = arith.constant 0 : i32
    %c0_i32_0 = arith.constant 0 : i32
    return %arg0, %c0_i32 : i32, i32
  }
  func.func @transform_2(%arg0: i32) -> (i32, i32) {
    %c0_i32 = arith.constant 0 : i32
    %c0_i32_0 = arith.constant 0 : i32
    return %arg0, %c0_i32 : i32, i32
  }
}

</mosaic_0001>

<bundles_post_ra>
// kernel: tpu_custom_call.1
= control target key start
LH: loop header
LB: loop body
LE: loop exit
PB: predicated region body
PF: predicated region fallthrough
CT: control target
= control target key end

     0   :  { %vm14_vm0 = vcmask 261120   ;;  %s142_s0 = inlined_call_operand.vmem [shape: f32[8,32], index: 0, kind: input, shape index: {}]   ;;  %s143_s1 = inlined_call_operand.vmem [shape: s32[8,1], index: 1, kind: input, shape index: {}]   ;;  %s144_s2 = inlined_call_operand.hbm [shape: f32[1,1], index: 2, kind: output, shape index: {}]  }
   0x1   :  { %v12_v0 = vld [vmem:[%s142_s0] sm:$0xff] }
   0x2   :  { %7 = vsyncpa [#allocation3], 0  ;;  %v15_v1 = vsel %vm14_vm0, %v12_v0, -inf  ;;  %v112_v2 = vmov 0   ;;  %v13_v3 = vld [vmem:[%s143_s1] sm:$0xff]  ;;  %v24_v9 = vlaneseq  ;;  %vm59_vm6 = vcmask 7168  }
   0x3   :  { %91 = vset.pattern.permute.xlu0 %v112_v2  ;;  %s77_s13 = sshll.u32 %s144_s2, 4  ;;  %s113_s15 = smov [#allocation2]   ;;  %s78_s13 = int_to_ptr.hbm [resolvable:$true] %s77_s13 }
   0x4   :  { %16 = vmax.xlane.f32.xlu0 %v15_v1  ;;  %v25_v10 = vand.u32 127, %v24_v9 }
  0x18   :  { %27 = vperm.xlu0 %91, %v13_v3  }
  0x77   :  { %v17_v4 = vpop.xlane.xlu0 %16 }
  0x78   :  { %v18_v5 = vsub.f32 %v12_v0, %v17_v4 }
  0x7a   :  { %v19_v6 = vmul.f32 1.442695, %v18_v5 }
  0x7c   :  { %92 = vpow2.f32 %v19_v6 }
  0x82   :  { %v93_v7 = vpop.eup %92 }
  0x83   :  { %v21_v8 = vsel %vm14_vm0, %v93_v7, 0.0 }
  0x84   :  { %22 = vadd.xlane.f32.xlu1 %v21_v8 }
  0x8a   :  { %v28_v11 = vpop.permute.xlu0 %27 }
  0x8b   :  { %vm29_vm1 = vcmp.eq.s32.totalorder %v25_v10, %v28_v11 }
  0x8c   :  { %v34_v12 = vsel %vm29_vm1, %v93_v7, 0.0  ;;  %v30_v13 = vsel %vm29_vm1, %v18_v5, 0.0 }
  0x8d   :  { %v35_v14 = vsel %vm14_vm0, %v34_v12, 0.0  ;;  %v31_v15 = vsel %vm14_vm0, %v30_v13, 0.0 }
  0x8e   :  { %36 = vadd.xlane.f32.xlu1 %v35_v14  ;;  %32 = vadd.xlane.f32.xlu2 %v31_v15 }
  0xf7   :  { %v23_v16 = vpop.xlane.xlu1 %22 }
  0xf8   :  { %94 = vrcp.f32 %v23_v16  ;;  %v52_v20 = vand.u32 2147483648, %v23_v16  ;;  %v50_v22 = vand.u32 2147483647, %v23_v16  ;;  %vm46_vm3 = vweird.f32 %v23_v16 }
  0xf9   :  { %96 = vlog2.f32 %v23_v16 }
  0xfa   :  { %v53_v25 = vor.u32 1.1754944e-38, %v52_v20  ;;  %vm51_vm5 = vcmp.eq.f32.partialorder %v50_v22, 8.507059e+37 }
  0xfe   :  { %v95_v17 = vpop.eup %94 }
  0xff   :  { %v42_v18 = vmul.f32 %v95_v17, %v23_v16  ;;  %vm47_vm2 = vweird.f32 %v95_v17  ;;  %v97_v24 = vpop.eup %96 }
 0x100   :  { %vm48_vm4 = vmor %vm46_vm3, %vm47_vm2  ;;  %v39_v30 = vmul.f32 0.6931472, %v97_v24 }
 0x101   :  { %v43_v19 = vsub.f32 1.0, %v42_v18  ;;  %v37_v28 = vpop.xlane.xlu1 %36  ;;  %v33_v31 = vpop.xlane.xlu2 %32 }
 0x102   :  { %v40_v34 = vsub.f32 %v39_v30, %v33_v31 }
 0x103   :  { %v44_v21 = vmul.f32 %v95_v17, %v43_v19 }
 0x105   :  { %v45_v23 = vadd.f32 %v95_v17, %v44_v21 }
 0x107   :  { %v49_v26 = vsel %vm48_vm4, %v95_v17, %v45_v23 }
 0x108   :  { %v54_v27 = vsel %vm51_vm5, %v53_v25, %v49_v26 }
 0x109   :  { %v55_v29 = vmul.f32 %v54_v27, %v37_v28 }
 0x10b   :  { %v56_v32 = vsub.f32 1.0, %v55_v29 }
 0x10d   :  { %v57_v33 = vmul.f32 %v56_v32, %v56_v32 }
 0x10f   :  { %v58_v35 = vmul.f32 %v57_v33, %v40_v34 }
 0x111   :  { %v60_v36 = vsel %vm59_vm6, %v58_v35, 0.0 }
 0x112   :  { %61 = vadd.xlane.f32.xlu2 %v60_v36 }
 0x185   :  { %v62_v37 = vpop.xlane.xlu2 %61 }
 0x186   :  { %v63_v38 = vrot.slane %v62_v37, 4 }
 0x188   :  { %v64_v39 = vadd.f32 %v63_v38, %v62_v37 }
 0x18a   :  { %v65_v40 = vrot.slane %v64_v39, 2 }
 0x18c   :  { %v66_v41 = vadd.f32 %v65_v40, %v64_v39 }
 0x18e   :  { %v67_v42 = vrot.slane %v66_v41, 1 }
 0x190   :  { %v68_v43 = vadd.f32 %v67_v42, %v66_v41 }
 0x192   :  { %87 = vpush %v68_v43 }
 0x1c3   :  { %s88_s14 = spop %87 }
 0x1c4   :  { %71 = sst [smem:[#allocation2]] %s88_s14 }
 0x1c5   :  { %80 = dma.smem_to_hbm %s113_s15, 16, %s78_s13, [#allocation3]  }
 0x1c6   :  { %110 = dma.done.wait [#allocation3], 16  }
 0x1c7   :  { %111 = vsyncadd [#allocation3], 4294967280 }
 0x1c8   :  { %85 = sfence }
 0x1c9   :  { %86 = vsyncpa [#allocation3], 1 }

</bundles_post_ra>
